<compile_context>
chip_gen: v7x
topology: tpu7x:2x2x1
jax: 0.10.0
libtpu: 0.0.40
codegen_flags: <defaults>
</compile_context>

<pallas_src>
import jax
import jax.numpy as jnp
from jax.experimental import pallas as pl
from jax.experimental.pallas import tpu as pltpu


# ---------------------------------------------------------------------------
# Kernel
# ---------------------------------------------------------------------------
def splitter_kernel(ex_ref, rec_ref, w1e_ref, w1r_ref, b1_ref,
                    w2eff_ref, beff_ref, out_ref):
    # ex_ref   : (TB, NE*F)  bf16  flattened example records (batch tile)
    # rec_ref  : (TB, F)     bf16  record_to_classify (batch tile)
    # w1e/w1r  : bf16 row-scattered first-layer weights ((NE*F, PH) / (F, PH))
    # b1       : (1, PH) f32 packed first-layer bias
    # w2eff    : (1, PH) f32 fused layer-2 + classifier weights
    # beff     : (1, 1)  f32 fused bias (wl . b2 + bl)
    # out_ref  : (1, TB) f32 lane-dense sigmoid output

    # First layer of every per-part MLP at once (packed along PH = sum H_i).
    h1 = jnp.dot(ex_ref[...], w1e_ref[...], preferred_element_type=jnp.float32)
    h1 = h1 + jnp.dot(rec_ref[...], w1r_ref[...],
                      preferred_element_type=jnp.float32)
    h1 = jnp.maximum(h1 + b1_ref[...], 0.0)                       # (TB, PH) f32

    # Fused layer-2 + classifier: logit[0, b] = sum_c w2eff[0, c] * h1[b, c]
    logit = jax.lax.dot_general(
        w2eff_ref[...], h1,
        dimension_numbers=(((1,), (1,)), ((), ())),
        preferred_element_type=jnp.float32)                       # (1, TB)
    logit = logit + beff_ref[...]

    # sigmoid: exp -> EUP, approx reciprocal -> EUP (no VPU divide, no inf)
    out_ref[...] = pl.reciprocal(1.0 + jnp.exp(-logit), approx=True)


# ---------------------------------------------------------------------------
# Host-side packing of the per-part parameters into fused weights
# ---------------------------------------------------------------------------
def _build_packed_params(part_params, classifier_params, arrays_lengths, n_ex):
    P = len(arrays_lengths)
    offs = [0]
    for L in arrays_lengths:
        offs.append(offs[-1] + L)
    F = offs[-1]

    hidden = [w1.shape[1] for (w1, _, _, _) in part_params]
    hoffs = [0]
    for H in hidden:
        hoffs.append(hoffs[-1] + H)
    PH = hoffs[-1]

    wl, bl = classifier_params                       # (P, 1), (1,)

    w1e = jnp.zeros((n_ex * F, PH), jnp.float32)     # rows: example_records cols
    w1r = jnp.zeros((F, PH), jnp.float32)            # rows: record_to_classify
    b1c = jnp.zeros((1, PH), jnp.float32)
    w2eff = jnp.zeros((1, PH), jnp.float32)          # fused layer2 + classifier
    beff = bl.reshape(1, 1).astype(jnp.float32)

    for i, (w1, b1, w2, b2) in enumerate(part_params):
        L, H = arrays_lengths[i], hidden[i]
        r0, c0 = offs[i], hoffs[i]
        # per-part input columns = [ five.flatten(1) (n_ex*L) ; one (L) ]
        for j in range(n_ex):
            w1e = w1e.at[j * F + r0: j * F + r0 + L,
                         c0: c0 + H].set(w1[j * L:(j + 1) * L])
        w1r = w1r.at[r0: r0 + L, c0: c0 + H].set(w1[n_ex * L:])
        b1c = b1c.at[0, c0: c0 + H].set(b1)
        # fused second layer + classifier:
        #   logit = sum_i wl[i] * (h1_i @ w2_i + b2_i) + bl
        w2eff = w2eff.at[0, c0: c0 + H].set(w2[:, 0] * wl[i, 0])
        beff = beff + b2[0] * wl[i, 0]

    return (w1e.astype(jnp.bfloat16), w1r.astype(jnp.bfloat16),
            b1c, w2eff, beff)


def _pick_batch_tile(B):
    """128-multiple tile with >=2 grid steps when possible (v7x megacore),
    capped so grid overhead is amortized; falls back to the full batch."""
    if B >= 256 and B % 128 == 0:
        tb = min(B // 2, 2048)
        tb = (tb // 128) * 128
        while tb > 128 and B % tb != 0:
            tb -= 128
        if tb >= 128 and B % tb == 0:
            return tb
    return B


# ---------------------------------------------------------------------------
# Wrapper
# ---------------------------------------------------------------------------
def splitter_model_forward(example_records, record_to_classify,
                           part_params, classifier_params, arrays_lengths,
                           batch_tile=None):
    """example_records: (B, NE, F); record_to_classify: (B, F) -> (B,)."""
    B, NE, F = example_records.shape
    assert sum(arrays_lengths) == F

    w1e, w1r, b1c, w2eff, beff = _build_packed_params(
        part_params, classifier_params, arrays_lengths, NE)
    PH = w1e.shape[1]

    # pure reshape (no transpose) + bf16 cast of the streamed activations
    ex_flat = example_records.reshape(B, NE * F).astype(jnp.bfloat16)
    rec = record_to_classify.astype(jnp.bfloat16)

    TB = _pick_batch_tile(B) if batch_tile is None else batch_tile
    assert B % TB == 0, (B, TB)
    # (8,128) block rule: either a full-batch block or a 128-multiple tile.
    assert TB == B or (TB % 128 == 0), (B, TB)

    out = pl.pallas_call(
        splitter_kernel,
        out_shape=jax.ShapeDtypeStruct((1, B), jnp.float32),
        grid=(B // TB,),
        in_specs=[
            pl.BlockSpec((TB, NE * F), lambda b: (b, 0)),   # ex_flat (batch tile)
            pl.BlockSpec((TB, F), lambda b: (b, 0)),        # rec     (batch tile)
            pl.BlockSpec((NE * F, PH), lambda b: (0, 0)),   # w1e  (one DMA total)
            pl.BlockSpec((F, PH), lambda b: (0, 0)),        # w1r
            pl.BlockSpec((1, PH), lambda b: (0, 0)),        # b1
            pl.BlockSpec((1, PH), lambda b: (0, 0)),        # w2eff (fused l2+clf)
            pl.BlockSpec((1, 1), lambda b: (0, 0)),         # beff
        ],
        out_specs=pl.BlockSpec((1, TB), lambda b: (0, b)),  # lane-dense output
        compiler_params=pltpu.CompilerParams(
            dimension_semantics=("parallel",)),
    )(ex_flat, rec, w1e, w1r, b1c, w2eff, beff)

    return out.reshape(-1)                          # matches .view(-1)


# ---------------------------------------------------------------------------
# Pure-JAX transcription of SplitterModel.forward (f32 reference)
# ---------------------------------------------------------------------------
def reference_forward(example_records, record_to_classify,
                      part_params, classifier_params, arrays_lengths):
    B, NE, _ = example_records.shape
    offs = [0]
    for L in arrays_lengths:
        offs.append(offs[-1] + L)
    n_parts = len(arrays_lengths)

    example_splitted = [
        [example_records[:, j, offs[i]:offs[i + 1]] for i in range(n_parts)]
        for j in range(NE)]
    one_splitted = [record_to_classify[:, offs[i]:offs[i + 1]]
                    for i in range(n_parts)]

    outputs = []
    for i, (w1, b1, w2, b2) in enumerate(part_params):
        one = one_splitted[i]                                           # (B, L)
        five = jnp.stack([example_splitted[j][i] for j in range(NE)],
                         axis=1)                                        # (B, NE, L)
        x = jnp.concatenate([five.reshape(B, -1), one], axis=1)         # (B,(NE+1)L)
        h = jnp.maximum(x @ w1 + b1, 0.0)
        outputs.append((h @ w2 + b2).reshape(-1))                       # (B,)

    wl, bl = classifier_params
    stacked = jnp.stack(outputs, axis=1)                                # (B, P)
    return jax.nn.sigmoid(stacked @ wl + bl).reshape(-1)


# ---------------------------------------------------------------------------
if __name__ == "__main__":
    B = 256                    # 2 grid steps of TB=128 (exercises tiling/megacore)
    NE = 5                     # number of example records (hard-coded 5 in spec)
    arrays_lengths = [3, 5, 4, 4]
    H = 32                     # hidden width of each per-part MLP (P*H = 128)
    F = sum(arrays_lengths)
    P = len(arrays_lengths)

    key = jax.random.PRNGKey(0)
    k_ex, k_rec, k_par = jax.random.split(key, 3)
    example_records = jax.random.normal(k_ex, (B, NE, F), jnp.float32)
    record_to_classify = jax.random.normal(k_rec, (B, F), jnp.float32)

    # deterministic synthetic parameters: one 2-layer MLP per split part
    part_params = []
    pk = k_par
    for L in arrays_lengths:
        pk, k1, k2, k3, k4 = jax.random.split(pk, 5)
        w1 = 0.2 * jax.random.normal(k1, ((NE + 1) * L, H), jnp.float32)
        b1 = 0.1 * jax.random.normal(k2, (H,), jnp.float32)
        w2 = 0.2 * jax.random.normal(k3, (H, 1), jnp.float32)
        b2 = 0.1 * jax.random.normal(k4, (1,), jnp.float32)
        part_params.append((w1, b1, w2, b2))
    pk, kc1, kc2 = jax.random.split(pk, 3)
    wl = 0.5 * jax.random.normal(kc1, (P, 1), jnp.float32)
    bl = 0.1 * jax.random.normal(kc2, (1,), jnp.float32)
    classifier_params = (wl, bl)

    out = splitter_model_forward(example_records, record_to_classify,
                                 part_params, classifier_params, arrays_lengths)
    out = jax.block_until_ready(out)

    ref = reference_forward(example_records, record_to_classify,
                            part_params, classifier_params, arrays_lengths)
    assert out.shape == (B,), out.shape
    # bf16 activations/weights + approx reciprocal -> loosened tolerance
    assert jnp.allclose(out, ref, atol=2e-2, rtol=2e-2), (out, ref)
    print("KERNEL_OK")
</pallas_src>

<mosaic_0001>
module attributes {stable_mosaic.version = 11 : i64} {
  func.func @splitter_kernel(%arg0: i32, %arg1: memref<128x80xbf16, #tpu.memory_space<vmem>>, %arg2: memref<128x16xbf16, #tpu.memory_space<vmem>>, %arg3: memref<80x128xbf16, #tpu.memory_space<vmem>>, %arg4: memref<16x128xbf16, #tpu.memory_space<vmem>>, %arg5: memref<1x128xf32, #tpu.memory_space<vmem>>, %arg6: memref<1x128xf32, #tpu.memory_space<vmem>>, %arg7: memref<1x1xf32, #tpu.memory_space<vmem>>, %arg8: memref<1x128xf32, #tpu.memory_space<vmem>>) attributes {dimension_semantics = [#tpu.dimension_semantics<parallel>], iteration_bounds = array<i64: 2>, scalar_prefetch = 0 : i64, scratch_operands = 0 : i64, tpu.core_type = #tpu.core_type<tc>, window_params = [{transform_indices = @transform_0, window_bounds = array<i64: 128, 80>}, {transform_indices = @transform_1, window_bounds = array<i64: 128, 16>}, {pipeline_mode = #tpu.pipeline_mode<synchronous>, transform_indices = @transform_2, window_bounds = array<i64: 80, 128>}, {pipeline_mode = #tpu.pipeline_mode<synchronous>, transform_indices = @transform_3, window_bounds = array<i64: 16, 128>}, {pipeline_mode = #tpu.pipeline_mode<synchronous>, transform_indices = @transform_4, window_bounds = array<i64: 1, 128>}, {pipeline_mode = #tpu.pipeline_mode<synchronous>, transform_indices = @transform_5, window_bounds = array<i64: 1, 128>}, {pipeline_mode = #tpu.pipeline_mode<synchronous>, transform_indices = @transform_6, window_bounds = array<i64: 1, 1>}, {transform_indices = @transform_7, window_bounds = array<i64: 1, 128>}]} {
    %c0 = arith.constant 0 : index
    %c0_0 = arith.constant 0 : index
    %0 = vector.load %arg1[%c0, %c0_0] : memref<128x80xbf16, #tpu.memory_space<vmem>>, vector<128x80xbf16>
    %c0_1 = arith.constant 0 : index
    %c0_2 = arith.constant 0 : index
    %1 = vector.load %arg3[%c0_1, %c0_2] : memref<80x128xbf16, #tpu.memory_space<vmem>>, vector<80x128xbf16>
    %cst = arith.constant dense<0.000000e+00> : vector<128x128xf32>
    %2 = tpu.matmul %0, %1, %cst {dimension_numbers = #tpu.dot_dimension_numbers<[1], [0], [0], [1], [0, 0, 1, 1], [], []>} : vector<128x80xbf16>, vector<80x128xbf16>, vector<128x128xf32> -> vector<128x128xf32>
    %c0_3 = arith.constant 0 : index
    %c0_4 = arith.constant 0 : index
    %3 = vector.load %arg2[%c0_3, %c0_4] : memref<128x16xbf16, #tpu.memory_space<vmem>>, vector<128x16xbf16>
    %c0_5 = arith.constant 0 : index
    %c0_6 = arith.constant 0 : index
    %4 = vector.load %arg4[%c0_5, %c0_6] : memref<16x128xbf16, #tpu.memory_space<vmem>>, vector<16x128xbf16>
    %cst_7 = arith.constant dense<0.000000e+00> : vector<128x128xf32>
    %5 = tpu.matmul %3, %4, %cst_7 {dimension_numbers = #tpu.dot_dimension_numbers<[1], [0], [0], [1], [0, 0, 1, 1], [], []>} : vector<128x16xbf16>, vector<16x128xbf16>, vector<128x128xf32> -> vector<128x128xf32>
    %6 = arith.addf %2, %5 : vector<128x128xf32>
    %c0_8 = arith.constant 0 : index
    %c0_9 = arith.constant 0 : index
    %7 = vector.load %arg5[%c0_8, %c0_9] : memref<1x128xf32, #tpu.memory_space<vmem>>, vector<1x128xf32>
    %8 = vector.broadcast %7 : vector<1x128xf32> to vector<128x128xf32>
    %9 = arith.addf %6, %8 : vector<128x128xf32>
    %cst_10 = arith.constant 0.000000e+00 : f32
    %10 = vector.broadcast %cst_10 : f32 to vector<128x128xf32>
    %11 = arith.maximumf %9, %10 : vector<128x128xf32>
    %c0_11 = arith.constant 0 : index
    %c0_12 = arith.constant 0 : index
    %12 = vector.load %arg6[%c0_11, %c0_12] : memref<1x128xf32, #tpu.memory_space<vmem>>, vector<1x128xf32>
    %cst_13 = arith.constant dense<0.000000e+00> : vector<1x128xf32>
    %13 = tpu.matmul %12, %11, %cst_13 {dimension_numbers = #tpu.dot_dimension_numbers<[1], [1], [0], [0], [0, 0, 1, 0], [], []>} : vector<1x128xf32>, vector<128x128xf32>, vector<1x128xf32> -> vector<1x128xf32>
    %c0_14 = arith.constant 0 : index
    %c0_15 = arith.constant 0 : index
    %14 = vector.load %arg7[%c0_14, %c0_15] : memref<1x1xf32, #tpu.memory_space<vmem>>, vector<1x1xf32>
    %15 = vector.broadcast %14 : vector<1x1xf32> to vector<1x128xf32>
    %16 = arith.addf %13, %15 : vector<1x128xf32>
    %cst_16 = arith.constant 0.000000e+00 : f32
    %17 = vector.broadcast %cst_16 : f32 to vector<1x128xf32>
    %18 = arith.subf %17, %16 : vector<1x128xf32>
    %19 = math.exp %18 : vector<1x128xf32>
    %cst_17 = arith.constant 1.000000e+00 : f32
    %20 = vector.broadcast %cst_17 : f32 to vector<1x128xf32>
    %21 = arith.addf %20, %19 : vector<1x128xf32>
    %22 = tpu.reciprocal %21 {approx = true} : vector<1x128xf32> -> vector<1x128xf32>
    %c0_18 = arith.constant 0 : index
    %c0_19 = arith.constant 0 : index
    %23 = vector.load %arg8[%c0_18, %c0_19] : memref<1x128xf32, #tpu.memory_space<vmem>>, vector<1x128xf32>
    tpu.vector_store %arg8[%c0_18, %c0_19], %22 {strides = array<i32>} : memref<1x128xf32, #tpu.memory_space<vmem>>, vector<1x128xf32>,
    return
  }
  func.func @transform_0(%arg0: i32) -> (i32, i32) {
    %c0_i32 = arith.constant 0 : i32
    %c0_i32_0 = arith.constant 0 : i32
    return %arg0, %c0_i32 : i32, i32
  }
  func.func @transform_1(%arg0: i32) -> (i32, i32) {
    %c0_i32 = arith.constant 0 : i32
    %c0_i32_0 = arith.constant 0 : i32
    return %arg0, %c0_i32 : i32, i32
  }
  func.func @transform_2(%arg0: i32) -> (i32, i32) {
    %c0_i32 = arith.constant 0 : i32
    %c0_i32_0 = arith.constant 0 : i32
    %c0_i32_1 = arith.constant 0 : i32
    return %c0_i32, %c0_i32_0 : i32, i32
  }
  func.func @transform_3(%arg0: i32) -> (i32, i32) {
    %c0_i32 = arith.constant 0 : i32
    %c0_i32_0 = arith.constant 0 : i32
    %c0_i32_1 = arith.constant 0 : i32
    return %c0_i32, %c0_i32_0 : i32, i32
  }
  func.func @transform_4(%arg0: i32) -> (i32, i32) {
    %c0_i32 = arith.constant 0 : i32
    %c0_i32_0 = arith.constant 0 : i32
    %c0_i32_1 = arith.constant 0 : i32
    return %c0_i32, %c0_i32_0 : i32, i32
  }
  func.func @transform_5(%arg0: i32) -> (i32, i32) {
    %c0_i32 = arith.constant 0 : i32
    %c0_i32_0 = arith.constant 0 : i32
    %c0_i32_1 = arith.constant 0 : i32
    return %c0_i32, %c0_i32_0 : i32, i32
  }
  func.func @transform_6(%arg0: i32) -> (i32, i32) {
    %c0_i32 = arith.constant 0 : i32
    %c0_i32_0 = arith.constant 0 : i32
    %c0_i32_1 = arith.constant 0 : i32
    return %c0_i32, %c0_i32_0 : i32, i32
  }
  func.func @transform_7(%arg0: i32) -> (i32, i32) {
    %c0_i32 = arith.constant 0 : i32
    %c0_i32_0 = arith.constant 0 : i32
    return %c0_i32, %arg0 : i32, i32
  }
}

</mosaic_0001>

<bundles_post_ra>
// kernel: tpu_custom_call.1
= control target key start
LH: loop header
LB: loop body
LE: loop exit
PB: predicated region body
PF: predicated region fallthrough
CT: control target
= control target key end

     0   :  { %s1463_s0 = inlined_call_operand.vmem [shape: bf16[256,80], index: 0, kind: input, shape index: {}]   ;;  %s1464_s1 = inlined_call_operand.vmem [shape: bf16[256,16], index: 1, kind: input, shape index: {}]   ;;  %s1465_s2 = inlined_call_operand.vmem [shape: bf16[80,128], index: 2, kind: input, shape index: {}]   ;;  %s1466_s3 = inlined_call_operand.vmem [shape: bf16[16,128], index: 3, kind: input, shape index: {}]   ;;  %s1467_s4 = inlined_call_operand.vmem [shape: f32[1,128], index: 4, kind: input, shape index: {}]   ;;  %s1468_s5 = inlined_call_operand.vmem [shape: f32[1,128], index: 5, kind: input, shape index: {}]   ;;  %s1469_s6 = inlined_call_operand.<no memory space> [shape: f32[1,1], index: 6, kind: input, shape index: {}]   ;;  %s1470_s7 = inlined_call_operand.hbm [shape: f32[1,256], index: 7, kind: output, shape index: {}]  }
   0x1   :  { %v12_v0 = vstv %s1469_s6 }
   0x2   :  { %13 = vst [vmem:[#allocation2] sm:$0x1] %v12_v0 }
   0x3   :  { %14 = vsyncpa [#allocation4], 0 }
   0x4   :  { %16 = vsyncpa [#allocation4 + $0x1], 0  ;;  %s1303_s26 = smov 0   ;;  %s1305_s27 = smov 0  }
   0x5   :  { %s1307_s28 = smov 0   ;;  %s1309_s29 = smov 0  }
   0x6 LB: > { %s912_s6 = sadd.s32 4294967295, %s1253_s29   ;;  %s913_s30 = sadd.s32 4294967294, %s1253_s29   ;;  %s1253_s29 = sphi %s1309_s29, %s1476_s29   ;;  %s1249_s28 = sphi %s1307_s28, %s1475_s28   ;;  %s1245_s27 = sphi %s1305_s27, %s1474_s27   ;;  %s1241_s26 = sphi %s1303_s26, %s1473_s26  }
   0x7   : > { %s1326_s8 = sadd.s32 1, %s1253_s29   ;;  %s186_s9 = sadd.s32 1, %s1249_s28 }
   0x8   : > { %s183_s10 = ssub.s32 %s1253_s29, %s1326_s8  ;;  %p196_p0 = scmp.ne.s32.totalorder %s1249_s28, %s1245_s27 }
   0x9   : > { %p184_p1 = scmp.eq.s32.totalorder %s183_s10, 0  ;;  %p197_p2 = scmp.eq.s32.totalorder %s912_s6, 1 }
   0xa   : > { %p202_p3 = scmp.ne.s32.totalorder %s1245_s27, %s1241_s26  ;;  %p203_p4 = scmp.eq.s32.totalorder %s913_s30, 1 }
   0xb   : > { %s1336_s11 = scalar_select %p184_p1, %s1249_s28, %s186_s9  }
   0xc   : > { %p1338_p5 = por %p197_p2, %p196_p0  ;;  %p1342_p6 = por %p203_p4, %p202_p3 }
   0xd   : > { %p916_p7 = scmp.ge.s32.totalorder %s1253_s29, 1  ;;  %p254_p8 = scmp.lt.s32.totalorder %s1253_s29, 3 }
   0xf   : > { %p255_p9 = pnand %p916_p7, %p254_p8 }
  0x10   : > { %v1165_v1 = vld [vmem:[%s1466_s3] sm:$0xff] (!%p255_p9)   ;;  %s1351_s16 = sshll.u32 (!%p255_p9), %s912_s6, 4  ;;  %vm393_vm0 = vcmask (!%p255_p9), 130048   ;;  %v1169_v3 = vld [vmem:[%s1465_s2 + $0x8] sm:$0xff] (!%p255_p9)   ;;  %v1172_v7 = vld [vmem:[%s1465_s2 + $0x10] sm:$0xff] (!%p255_p9)   ;;  %vm585_vm1 = vcmask (!%p255_p9), 654336  }
  0x11   : > { %258 = sbr.rel (%p255_p9) target bundleno = 602 (0x25a), region = 48  ;;  %p291_p10 = scmp.lt.s32.totalorder (!%p255_p9), %s1351_s16, 31  ;;  %1002 = vmatprep.subr.bf16.mxu0 (!%p255_p9), %v1165_v1  ;;  %v1167_v2 = vld [vmem:[%s1465_s2] sm:$0xff] (!%p255_p9)   ;;  %v1175_v10 = vld [vmem:[%s1465_s2 + $0x18] sm:$0xff] (!%p255_p9)   ;;  %v1255_v23 = vmov (!%p255_p9), 0.0|0.0   ;;  %vm1256_vm2 = vmmov (!%p255_p9), 0  }
  0x12   : > { %1003 = vmatpush3.bf16.msra.mxu0 (!%p255_p9), %v1165_v1  ;;  %v1178_v11 = vld [vmem:[%s1465_s2 + $0x20] sm:$0xff] (!%p255_p9)   ;;  %1081 = vmatprep.subr.bf16.mxu1 (!%p255_p9), %v1255_v23  ;;  %v1257_v24 = vmov (!%p255_p9), 0.0   ;;  %v1258_v26 = vmov (!%p255_p9), 0   ;;  %s288_s24 = sand.u32 (!%p255_p9), 1, %s1245_s27   ;;  %s1421_s10 = scalar_lea.hbm (!%p255_p9), %s1470_s7, %s1351_s16 }
  0x13   : > { %1020 = vmatprep.subr.bf16.mxu0 (!%p255_p9), %v1167_v2  ;;  %1078 = vmatprep.mubr.msk.f32.mxu1 (!%p255_p9), %vm1256_vm2, %v1257_v24  ;;  %v747_v25 = vld [vmem:[#allocation2] sm:$0x1] (!%p255_p9)  ;;  %s289_s25 = scalar_lea.vmem (!%p255_p9), [#allocation3], %s288_s24  ;;  %s1259_s17 = smov (!%p255_p9), [#allocation3]  }
  0x14   : > { %1164 = vset.pattern.permute.xlu0 (!%p255_p9), %v1258_v26  ;;  %v959_v27 = vld [vmem:[%s1467_s4] ss:$0 sm:$0xff] (!%p255_p9)  ;;  %s846_s6 = sshll.u32 (!%p255_p9), %s289_s25, 4  ;;  %s1195_s18 = sshll.u32 (!%p255_p9), %s1259_s17, 4  ;;  %s1423_s6 = int_to_ptr.vmem [resolvable:$true] %s846_s6  ;;  %s1196_s18 = int_to_ptr.vmem [resolvable:$false] %s1195_s18 }
  0x15   : > { %750 = vperm.xlu0 (!%p255_p9), %1164, %v747_v25   ;;  %s1191_s15 = scalar_lea.vmem (!%p255_p9), %s1423_s6, 16  ;;  %p1198_p0 = scmp.lt.s32.totalorder (!%p255_p9), %s1423_s6, %s1196_s18 }
  0x16   : > { %p1192_p11 = scmp.ne.s32.totalorder (!%p255_p9), %s1423_s6, %s1191_s15 }
  0x18   : > { %s292_s19 = scalar_select %p291_p10, %s1351_s16, 31 }
  0x19   : > { %p1193_p12 = pnand %p1192_p11, %p1338_p5 }
  0x1a   : > { %s918_s20 = sshll.u32 %s292_s19, 2  ;;  %s1197_s19 = scalar_lea.vmem %s1196_s18, 32 }
  0x1b   : > { %s300_s23 = scalar_lea.vmem %s1464_s1, %s918_s20  ;;  %s1373_s14 = scalar_lea.vmem %s1463_s0, %s918_s20 }
  0x1c   : > { %v1166_v4 = vld [vmem:[%s300_s23] sm:$0xff]   ;;  %v1168_v5 = vld [vmem:[%s300_s23 + $0x8] sm:$0xff]   ;;  %v1170_v6 = vld [vmem:[%s300_s23 + $0x10] sm:$0xff]   ;;  %p1194_p13 = pneg %p1193_p12  ;;  %p1199_p1 = scmp.lt.s32.totalorder %s1197_s19, %s1191_s15 }
  0x1d   : > { %1004 = vmatprep.mubr.msk.bf16.mxu0 %vm393_vm0, %v1166_v4  ;;  %v1171_v8 = vld [vmem:[%s300_s23 + $0x18] sm:$0xff]   ;;  %v1173_v9 = vld [vmem:[%s300_s23 + $0x20] sm:$0xff]   ;;  %v1174_v12 = vld [vmem:[%s300_s23 + $0x28] sm:$0xff]  }
  0x1e   : > { %1005 = vmatmul.mubr.msk.bf16.vlgmr.msra.gmra.mrb[0].mxu0 %vm393_vm0, %v1168_v5  ;;  %v1176_v13 = vld [vmem:[%s300_s23 + $0x30] sm:$0xff]   ;;  %v1177_v14 = vld [vmem:[%s300_s23 + $0x38] sm:$0xff]   ;;  %v1179_v15 = vld [vmem:[%s1373_s14] sm:$0xff]   ;;  %p1200_p2 = por %p1199_p1, %p1198_p0 }
  0x1f   : > { %1021 = vmatpush3.bf16.msra.mxu0 %v1167_v2  ;;  %1008 = vmatprep.mubr.msk.bf16.mxu0 %vm393_vm0, %v1170_v6  ;;  %v1180_v16 = vld [vmem:[%s1373_s14 + $0x8] sm:$0xff]   ;;  %v1181_v17 = vld [vmem:[%s1373_s14 + $0x10] sm:$0xff]   ;;  %v1182_v18 = vld [vmem:[%s1373_s14 + $0x18] sm:$0xff]  }
  0x20   : > { %1022 = vmatprep.subr.bf16.mxu0 %v1169_v3  ;;  %v1183_v19 = vld [vmem:[%s1373_s14 + $0x20] sm:$0xff]   ;;  %v1184_v20 = vld [vmem:[%s1373_s14 + $0x28] sm:$0xff]   ;;  %v1185_v21 = vld [vmem:[%s1373_s14 + $0x30] sm:$0xff]   ;;  %p1201_p3 = pnand %p1200_p2, %p1194_p13 }
  0x21   : > { %v1186_v22 = vld [vmem:[%s1373_s14 + $0x38] sm:$0xff]   ;;  %s834_s14 = scalar_lea.sflag [#allocation4], %s288_s24 }
  0x23   : > { %1023 = vmatpush3.bf16.msra.mxu0 %v1169_v3 }
  0x24   : > { %1024 = vmatprep.subr.bf16.mxu0 %v1172_v7 }
  0x26   : > { %1009 = vmatmul.mubr.msk.bf16.gmra.mrb[4].mxu0 %vm393_vm0, %v1171_v8 }
  0x27   : > { %1025 = vmatpush3.bf16.msra.mxu0 %v1172_v7  ;;  %1012 = vmatprep.mubr.msk.bf16.mxu0 %vm393_vm0, %v1173_v9 }
  0x28   : > { %1026 = vmatprep.subr.bf16.mxu0 %v1175_v10 }
  0x2b   : > { %1027 = vmatpush3.bf16.msra.mxu0 %v1175_v10 }
  0x2c   : > { %1028 = vmatprep.subr.bf16.mxu0 %v1178_v11 }
  0x2e   : > { %1013 = vmatmul.mubr.msk.bf16.gmra.mrb[8].mxu0 %vm393_vm0, %v1174_v12 }
  0x2f   : > { %1016 = vmatprep.mubr.msk.bf16.mxu0 %vm393_vm0, %v1176_v13  ;;  %1029 = vmatpush3.bf16.msra.mxu0 %v1178_v11 }
  0x36   : > { %1017 = vmatmul.mubr.msk.bf16.gmra.mrb[12].mxu0 %vm393_vm0, %v1177_v14 }
  0x37   : > { %1030 = vmatprep.mubr.msk.bf16.mxu0 %vm585_vm1, %v1179_v15 }
  0x3e   : > { %1031 = vmatmul.mubr.msk.bf16.vlgmr.msra.gmra.mrb[0].mxu0 %vm585_vm1, %v1180_v16 }
  0x3f   : > { %1034 = vmatprep.mubr.msk.bf16.mxu0 %vm585_vm1, %v1181_v17 }
  0x46   : > { %1035 = vmatmul.mubr.msk.bf16.gmra.mrb[4].mxu0 %vm585_vm1, %v1182_v18 }
  0x47   : > { %1038 = vmatprep.mubr.msk.bf16.mxu0 %vm585_vm1, %v1183_v19 }
  0x4e   : > { %1039 = vmatmul.mubr.msk.bf16.gmra.mrb[8].mxu0 %vm585_vm1, %v1184_v20  ;;  %v746_v20 = vld [vmem:[%s1468_s5] sm:$0x1] }
  0x4f   : > { %1042 = vmatprep.mubr.msk.bf16.mxu0 %vm585_vm1, %v1185_v21  ;;  %v753_v21 = vlaneseq }
  0x56   : > { %1043 = vmatmul.mubr.msk.bf16.gmra.mrb[12].mxu0 %vm585_vm1, %v1186_v22  ;;  %v754_v22 = vshrl.u32 %v753_v21, 7 }
  0x58   : > { %v755_v24 = vsub.s32 0, %v754_v22 }
  0x94   : > { %v751_v25 = vpop.permute.xlu0 %750 }
  0x95   : > { %v756_v26 = vrot.slane %v751_v25, %v755_v24 }
 0x111   : > { %v1032_v28 = vpop.f32.mrb[0].mxu0 }
 0x112   : > { %v716_v29 = vadd.f32 %v1032_v28, %v959_v27  ;;  %v644_v30 = vpop.f32.mrb[1].mxu0 }
 0x113   : > { %v714_v31 = vadd.f32 %v959_v27, %v644_v30  ;;  %v1033_v32 = vpop.f32.mrb[2].mxu0 }
 0x114   : > { %v717_v33 = vadd.f32 %v1033_v32, %v959_v27  ;;  %v647_v34 = vpop.f32.mrb[3].mxu0  ;;  %v732_v36 = vmax.f32 %v716_v29, 0.0 }
 0x115   : > { %v715_v35 = vadd.f32 %v959_v27, %v647_v34  ;;  %v730_v38 = vmax.f32 %v714_v31, 0.0 }
 0x116   : > { %v733_v37 = vmax.f32 %v717_v33, 0.0 }
 0x117   : > { %v731_v39 = vmax.f32 %v715_v35, 0.0 }
 0x118   : > { %v1085_v40 = vpack.c.bf16 %v733_v37, %v732_v36 }
 0x119   : > { %v1036_v41 = vpop.f32.mrb[4].mxu0  ;;  %v1082_v42 = vpack.c.bf16 %v731_v39, %v730_v38 }
 0x11a   : > { %v720_v43 = vadd.f32 %v1036_v41, %v959_v27  ;;  %v660_v44 = vpop.f32.mrb[5].mxu0 }
 0x11b   : > { %v718_v45 = vadd.f32 %v959_v27, %v660_v44  ;;  %v1037_v46 = vpop.f32.mrb[6].mxu0  ;;  %1083 = vmatpush3.bf16.xpose.msra.mxu1 %v1082_v42 }
 0x11c   : > { %v721_v47 = vadd.f32 %v1037_v46, %v959_v27  ;;  %v663_v48 = vpop.f32.mrb[7].mxu0  ;;  %1084 = vmatprep.subr.bf16.mxu1 %v1255_v23  ;;  %v736_v50 = vmax.f32 %v720_v43, 0.0 }
 0x11d   : > { %v719_v49 = vadd.f32 %v959_v27, %v663_v48  ;;  %v734_v52 = vmax.f32 %v718_v45, 0.0 }
 0x11e   : > { %v737_v51 = vmax.f32 %v721_v47, 0.0 }
 0x11f   : > { %v735_v53 = vmax.f32 %v719_v49, 0.0 }
 0x120   : > { %v1091_v54 = vpack.c.bf16 %v737_v51, %v736_v50 }
 0x121   : > { %v1088_v55 = vpack.c.bf16 %v735_v53, %v734_v52  ;;  %v1040_v56 = vpop.f32.mrb[8].mxu0 }
 0x122   : > { %v724_v57 = vadd.f32 %v1040_v56, %v959_v27  ;;  %v676_v58 = vpop.f32.mrb[9].mxu0 }
 0x123   : > { %v722_v59 = vadd.f32 %v959_v27, %v676_v58  ;;  %v1041_v60 = vpop.f32.mrb[10].mxu0  ;;  %1086 = vmatpush3.bf16.xpose.msra.mxu1 %v1085_v40 }
 0x124   : > { %v725_v61 = vadd.f32 %v1041_v60, %v959_v27  ;;  %v679_v62 = vpop.f32.mrb[11].mxu0  ;;  %1087 = vmatprep.subr.bf16.mxu1 %v1255_v23  ;;  %v740_v0 = vmax.f32 %v724_v57, 0.0 }
 0x125   : > { %v723_v63 = vadd.f32 %v959_v27, %v679_v62  ;;  %v738_v2 = vmax.f32 %v722_v59, 0.0 }
 0x126   : > { %v741_v1 = vmax.f32 %v725_v61, 0.0 }
 0x127   : > { %v739_v3 = vmax.f32 %v723_v63, 0.0 }
 0x128   : > { %v1097_v4 = vpack.c.bf16 %v741_v1, %v740_v0 }
 0x129   : > { %v1094_v5 = vpack.c.bf16 %v739_v3, %v738_v2  ;;  %v1044_v6 = vpop.f32.mrb[12].mxu0 }
 0x12a   : > { %v728_v7 = vadd.f32 %v1044_v6, %v959_v27  ;;  %v692_v8 = vpop.f32.mrb[13].mxu0 }
 0x12b   : > { %v726_v9 = vadd.f32 %v959_v27, %v692_v8  ;;  %v1045_v10 = vpop.f32.mrb[14].mxu0  ;;  %1089 = vmatpush3.bf16.xpose.msra.mxu1 %v1088_v55 }
 0x12c   : > { %v729_v11 = vadd.f32 %v1045_v10, %v959_v27  ;;  %v695_v12 = vpop.f32.mrb[15].mxu0  ;;  %1090 = vmatprep.subr.bf16.mxu1 %v1255_v23  ;;  %v744_v14 = vmax.f32 %v728_v7, 0.0 }
 0x12d   : > { %v727_v13 = vadd.f32 %v959_v27, %v695_v12  ;;  %v742_v16 = vmax.f32 %v726_v9, 0.0 }
 0x12e   : > { %v745_v15 = vmax.f32 %v729_v11, 0.0 }
 0x12f   : > { %v743_v17 = vmax.f32 %v727_v13, 0.0 }
 0x130   : > { %v1103_v18 = vpack.c.bf16 %v745_v15, %v744_v14 }
 0x131   : > { %v1100_v19 = vpack.c.bf16 %v743_v17, %v742_v16 }
 0x133   : > { %1092 = vmatpush3.bf16.xpose.msra.mxu1 %v1091_v54 }
 0x134   : > { %1093 = vmatprep.subr.bf16.mxu1 %v1255_v23 }
 0x13b   : > { %1095 = vmatpush3.bf16.xpose.msra.mxu1 %v1094_v5 }
 0x13c   : > { %1096 = vmatprep.subr.bf16.mxu1 %v1255_v23 }
 0x143   : > { %1098 = vmatpush3.bf16.xpose.msra.mxu1 %v1097_v4 }
 0x144   : > { %1099 = vmatprep.subr.bf16.mxu1 %v1255_v23 }
 0x14b   : > { %1101 = vmatpush3.bf16.xpose.msra.mxu1 %v1100_v19 }
 0x14c   : > { %1102 = vmatprep.subr.bf16.mxu1 %v1255_v23 }
 0x153   : > { %1104 = vmatpush3.bf16.xpose.msra.mxu1 %v1103_v18 }
 0x15a   : > { %1079 = vmatmul.mubr.f32.vlgmr.msra.gmra.mrb[0].mxu1 %v746_v20 }
 0x22d   : > { %v823_v27 = vpop.f32.mrb[0].mxu1 }
 0x22e   : > { %v824_v28 = vadd.f32 %v823_v27, %v756_v26  ;;  %v1080_v29 = vpop.f32.mrb[1].mxu1 }
 0x230   : > { %v827_v30 = vsub.f32 0.0, %v824_v28 }
 0x232   : > { %v828_v31 = vmul.f32 1.442695, %v827_v30 }
 0x234   : > { %1187 = vpow2.f32 %v828_v31 }
 0x23e   : > { %v1188_v23 = vpop.eup %1187 }
 0x23f   : > { %v830_v32 = vadd.f32 1.0, %v1188_v23 }
 0x241   : > { %1189 = vrcp.f32 %v830_v32 }
 0x24b   : > { %v1190_v33 = vpop.eup %1189 }
 0x24c   : > { %832 = vst [vmem:[%s289_s25] sm:$0x1] %v1190_v33 }
 0x24d   : > { %1204 = shalt.err (!%p1201_p3)
}
 0x24e   : > { %s1205_s16 = scalar_lea.hbm %s1421_s10, 16  ;;  %s1209_s22 = scalar_lea.hbm %s1470_s7, 32 }
 0x24f   : > { %p1206_p4 = scmp.ne.s32.totalorder %s1421_s10, %s1205_s16  ;;  %p1210_p9 = scmp.lt.u32.totalorder %s1421_s10, %s1470_s7 }
 0x250   : > { %p1211_p10 = scmp.lt.u32.totalorder %s1209_s22, %s1205_s16  ;;  %p1213_p12 = scmp.lt.u32.totalorder %s1205_s16, %s1421_s10 }
 0x251   : > { %p1207_p7 = pnand %p1206_p4, %p1338_p5 }
 0x252   : > { %p1212_p11 = por %p1211_p10, %p1210_p9 }
 0x253   : > { %p1208_p8 = pneg %p1207_p7 }
 0x254   : > { %p1214_p13 = por %p1213_p12, %p1212_p11 }
 0x256   : > { %p1215_p0 = pnand %p1214_p13, %p1208_p8 }
 0x258   : > { %1218 = shalt.err (!%p1215_p0)
}
 0x259   : > { %1121 = dma.vmem_to_hbm [thread:$0]  (%p1338_p5), %s1423_s6, 16, %s1421_s10, %s834_s14  }
 0x25a PF: > { %p1127_p1 = scmp.ge.s32.totalorder %s1253_s29, 2  ;;  %s858_s25 = sand.u32 1, %s1241_s26  }
 0x25b   : > { %s859_s30 = scalar_lea.sflag [#allocation4], %s858_s25 }
 0x25c   : > { %p1124_p2 = pnand %p1127_p1, %p1342_p6 }
 0x25e   : > { %1236 = dma.done.wait (!%p1124_p2), %s859_s30, 16  }
 0x25f   : > { %1238 = vsyncadd (!%p1124_p2), %s859_s30, 4294967280  ;;  %p19_p3 = scmp.ge.s32.totalorder %s1326_s8, 4   ;;  %s1473_s26 = smov %s1245_s27 }
 0x260   : > { %s1474_s27 = smov %s1249_s28  ;;  %s1475_s28 = smov %s1336_s11 }
 0x261   : > { %s1476_s29 = smov %s1326_s8  ;;  %21 = sbr.rel (!%p19_p3) target bundleno = 6 (0x6), region = 86 }
 0x268   :  { %863 = vsyncpa [#allocation4], 1 }
 0x269   :  { %865 = vsyncpa [#allocation4 + $0x1], 1 }

</bundles_post_ra>
